<compile_context>
chip_gen: v7x
topology: tpu7x:2x2x1
jax: 0.10.0
libtpu: 0.0.40
codegen_flags: <defaults>
</compile_context>

<pallas_src>
import jax
import jax.numpy as jnp
from jax.experimental import pallas as pl
from jax.experimental.pallas import tpu as pltpu


# --------------------------------------------------------------------------
# Kernels
# --------------------------------------------------------------------------

def _gcn_first_kernel(a_ref, x_ref, w_ref, b_ref, o_ref):
    """o = relu((Â_rows @ X) @ W1 + b1)  -- re-associated because C_in << 300."""
    ax = jnp.dot(a_ref[...], x_ref[...].astype(jnp.bfloat16),
                 preferred_element_type=jnp.float32)            # [TN, C_in] f32
    h = jnp.dot(ax.astype(jnp.bfloat16), w_ref[...].astype(jnp.bfloat16),
                preferred_element_type=jnp.float32)             # [TN, 300] f32
    o_ref[...] = jnp.maximum(h + b_ref[...], 0.0).astype(o_ref.dtype)


def _transform_kernel(h_ref, w_ref, o_ref):
    """T_rows = H_rows @ W   (row-tiled, bf16 MXU inputs, f32 accumulate)."""
    t = jnp.dot(h_ref[...].astype(jnp.bfloat16), w_ref[...].astype(jnp.bfloat16),
                preferred_element_type=jnp.float32)
    o_ref[...] = t.astype(o_ref.dtype)                          # stored bf16


def _propagate_kernel(a_ref, t_ref, b_ref, o_ref):
    """o_rows = relu(Â_rows @ T + b)   (T already bf16)."""
    h = jnp.dot(a_ref[...], t_ref[...], preferred_element_type=jnp.float32)
    o_ref[...] = jnp.maximum(h + b_ref[...], 0.0).astype(o_ref.dtype)


def _propagate_fc_kernel(a_ref, t_ref, b_ref, wfc_ref, bfc_ref, o_ref):
    """Last GCN propagate + folded fc1∘fc2:  (relu(Â_rows @ T + b3)) @ Wfc + bfc."""
    h = jnp.dot(a_ref[...], t_ref[...], preferred_element_type=jnp.float32)
    h = jnp.maximum(h + b_ref[...], 0.0)                        # [TN, out] f32
    y = jnp.dot(h, wfc_ref[...], preferred_element_type=jnp.float32) + bfc_ref[...]
    o_ref[...] = y.astype(o_ref.dtype)


# --------------------------------------------------------------------------
# Wrapper
# --------------------------------------------------------------------------

def _pick_row_tile(n):
    """Largest convenient row tile that divides N (8-aligned); else whole N."""
    for cand in (512, 256, 128, 64, 32, 16, 8):
        if cand < n and n % cand == 0:
            return cand
    return n


def anomaly_anticipation_forward(x, edge_index, params):
    """x: [N, in_channels] float32; edge_index: [2, E] int32 (src, dst)."""
    n = x.shape[0]
    (w1, b1, w2, b2, w3, b3, wf1, bf1, wf2, bf2) = params

    # ---- glue: Â = D^-1/2 (A + I) D^-1/2  (dense, PyG gcn_norm semantics) ----
    # GCNConv aggregates src -> dst, so Â[dst, src] = norm and propagation is Â @ X.
    src, dst = edge_index[0], edge_index[1]
    adj = jnp.zeros((n, n), dtype=jnp.float32).at[dst, src].add(1.0)   # sum multi-edges
    diag = jnp.diagonal(adj)
    adj = adj + jnp.diag(jnp.where(diag == 0, 1.0, 0.0))               # add *remaining* self loops
    deg = jnp.sum(adj, axis=1)
    dinv = jnp.where(deg > 0, 1.0 / jnp.sqrt(deg), 0.0)
    a_norm = adj * dinv[:, None] * dinv[None, :]
    a_bf16 = a_norm.astype(jnp.bfloat16)                              # MXU-friendly operand

    # ---- fold fc1/fc2 at trace time (exact: no activation between them) ----
    wfc = wf1 @ wf2                 # [out_channels, 1]
    bfc = bf1 @ wf2 + bf2           # [1, 1]

    tn = _pick_row_tile(n)
    grid = (n // tn,)
    cparams = pltpu.CompilerParams(
        dimension_semantics=("parallel",),      # shard row blocks across TCs (v7x)
        vmem_limit_bytes=32 * 1024 * 1024,      # headroom beyond v5e's 16 MiB default
    )

    def full_spec(arr):
        return pl.BlockSpec(arr.shape, lambda i: (0, 0))

    def row_spec(cols):
        return pl.BlockSpec((tn, cols), lambda i: (i, 0))

    a_spec = pl.BlockSpec((tn, n), lambda i: (i, 0))

    # ---- GCNConv 1: relu((Â @ X) @ W1 + b1) ----
    h = pl.pallas_call(
        _gcn_first_kernel,
        out_shape=jax.ShapeDtypeStruct((n, w1.shape[1]), jnp.float32),
        grid=grid,
        in_specs=[a_spec, full_spec(x), full_spec(w1), full_spec(b1)],
        out_specs=row_spec(w1.shape[1]),
        compiler_params=cparams,
    )(a_bf16, x, w1, b1)

    # ---- GCNConv 2 & 3: transform (H @ W) then propagate (Â @ T + b, relu) ----
    for w, b, last in ((w2, b2, False), (w3, b3, True)):
        t = pl.pallas_call(
            _transform_kernel,
            out_shape=jax.ShapeDtypeStruct((n, w.shape[1]), jnp.bfloat16),
            grid=grid,
            in_specs=[row_spec(w.shape[0]), full_spec(w)],
            out_specs=row_spec(w.shape[1]),
            compiler_params=cparams,
        )(h, w)

        if not last:
            h = pl.pallas_call(
                _propagate_kernel,
                out_shape=jax.ShapeDtypeStruct((n, w.shape[1]), jnp.float32),
                grid=grid,
                in_specs=[a_spec, full_spec(t), full_spec(b)],
                out_specs=row_spec(w.shape[1]),
                compiler_params=cparams,
            )(a_bf16, t, b)
        else:
            # last GCN layer: fuse relu + folded fc1/fc2 epilogue
            out = pl.pallas_call(
                _propagate_fc_kernel,
                out_shape=jax.ShapeDtypeStruct((n, 1), jnp.float32),
                grid=grid,
                in_specs=[a_spec, full_spec(t), full_spec(b),
                          full_spec(wfc), full_spec(bfc)],
                out_specs=row_spec(1),
                compiler_params=cparams,
            )(a_bf16, t, b, wfc, bfc)

    return out


# --------------------------------------------------------------------------
# Parameter init (shapes match the torch module)
# --------------------------------------------------------------------------

def init_params(key, in_channels, out_channels):
    ks = jax.random.split(key, 10)

    def dense(k, fan_in, fan_out):
        scale = 1.0 / jnp.sqrt(jnp.float32(fan_in))
        return jax.random.uniform(k, (fan_in, fan_out), jnp.float32, -scale, scale)

    def bias(k, fan_in, fan_out):
        scale = 1.0 / jnp.sqrt(jnp.float32(fan_in))
        return jax.random.uniform(k, (1, fan_out), jnp.float32, -scale, scale)

    w1, b1 = dense(ks[0], in_channels, 300), bias(ks[1], in_channels, 300)
    w2, b2 = dense(ks[2], 300, 100),          bias(ks[3], 300, 100)
    w3, b3 = dense(ks[4], 100, out_channels), bias(ks[5], 100, out_channels)
    wf1, bf1 = dense(ks[6], out_channels, 16), bias(ks[7], out_channels, 16)
    wf2, bf2 = dense(ks[8], 16, 1),            bias(ks[9], 16, 1)
    return (w1, b1, w2, b2, w3, b3, wf1, bf1, wf2, bf2)


if __name__ == "__main__":
    key = jax.random.PRNGKey(0)
    k_x, k_e, k_p = jax.random.split(key, 3)

    # Small graph: 16 nodes, 4 input features per node, 8-dim GCN output.
    num_nodes, in_channels, out_channels, num_edges = 16, 4, 8, 32

    x = jax.random.normal(k_x, (num_nodes, in_channels), dtype=jnp.float32)
    edge_index = jax.random.randint(k_e, (2, num_edges), 0, num_nodes, dtype=jnp.int32)
    params = init_params(k_p, in_channels, out_channels)

    y = anomaly_anticipation_forward(x, edge_index, params)
    y = jax.block_until_ready(y)
    assert y.shape == (num_nodes, 1) and y.dtype == jnp.float32
    print("KERNEL_OK")
</pallas_src>

<mosaic_0001>
module attributes {stable_mosaic.version = 11 : i64} {
  func.func @_gcn_first_kernel(%arg0: i32, %arg1: memref<8x16xbf16, #tpu.memory_space<vmem>>, %arg2: memref<16x4xf32, #tpu.memory_space<vmem>>, %arg3: memref<4x300xf32, #tpu.memory_space<vmem>>, %arg4: memref<1x300xf32, #tpu.memory_space<vmem>>, %arg5: memref<8x300xf32, #tpu.memory_space<vmem>>) attributes {dimension_semantics = [#tpu.dimension_semantics<parallel>], iteration_bounds = array<i64: 2>, scalar_prefetch = 0 : i64, scratch_operands = 0 : i64, tpu.core_type = #tpu.core_type<tc>, window_params = [{transform_indices = @transform_0, window_bounds = array<i64: 8, 16>}, {pipeline_mode = #tpu.pipeline_mode<synchronous>, transform_indices = @transform_1, window_bounds = array<i64: 16, 4>}, {pipeline_mode = #tpu.pipeline_mode<synchronous>, transform_indices = @transform_2, window_bounds = array<i64: 4, 300>}, {pipeline_mode = #tpu.pipeline_mode<synchronous>, transform_indices = @transform_3, window_bounds = array<i64: 1, 300>}, {transform_indices = @transform_4, window_bounds = array<i64: 8, 300>}]} {
    %c0 = arith.constant 0 : index
    %c0_0 = arith.constant 0 : index
    %0 = vector.load %arg1[%c0, %c0_0] : memref<8x16xbf16, #tpu.memory_space<vmem>>, vector<8x16xbf16>
    %c0_1 = arith.constant 0 : index
    %c0_2 = arith.constant 0 : index
    %1 = vector.load %arg2[%c0_1, %c0_2] : memref<16x4xf32, #tpu.memory_space<vmem>>, vector<16x4xf32>
    %2 = arith.truncf %1 : vector<16x4xf32> to vector<16x4xbf16>
    %cst = arith.constant dense<0.000000e+00> : vector<8x4xf32>
    %3 = tpu.matmul %0, %2, %cst {dimension_numbers = #tpu.dot_dimension_numbers<[1], [0], [0], [1], [0, 0, 1, 1], [], []>} : vector<8x16xbf16>, vector<16x4xbf16>, vector<8x4xf32> -> vector<8x4xf32>
    %4 = arith.truncf %3 : vector<8x4xf32> to vector<8x4xbf16>
    %c0_3 = arith.constant 0 : index
    %c0_4 = arith.constant 0 : index
    %5 = vector.load %arg3[%c0_3, %c0_4] : memref<4x300xf32, #tpu.memory_space<vmem>>, vector<4x300xf32>
    %6 = arith.truncf %5 : vector<4x300xf32> to vector<4x300xbf16>
    %cst_5 = arith.constant dense<0.000000e+00> : vector<8x300xf32>
    %7 = tpu.matmul %4, %6, %cst_5 {dimension_numbers = #tpu.dot_dimension_numbers<[1], [0], [0], [1], [0, 0, 1, 1], [], []>} : vector<8x4xbf16>, vector<4x300xbf16>, vector<8x300xf32> -> vector<8x300xf32>
    %c0_6 = arith.constant 0 : index
    %c0_7 = arith.constant 0 : index
    %8 = vector.load %arg4[%c0_6, %c0_7] : memref<1x300xf32, #tpu.memory_space<vmem>>, vector<1x300xf32>
    %9 = vector.broadcast %8 : vector<1x300xf32> to vector<8x300xf32>
    %10 = arith.addf %7, %9 : vector<8x300xf32>
    %cst_8 = arith.constant 0.000000e+00 : f32
    %11 = vector.broadcast %cst_8 : f32 to vector<8x300xf32>
    %12 = arith.maximumf %10, %11 : vector<8x300xf32>
    %c0_9 = arith.constant 0 : index
    %c0_10 = arith.constant 0 : index
    %13 = vector.load %arg5[%c0_9, %c0_10] : memref<8x300xf32, #tpu.memory_space<vmem>>, vector<8x300xf32>
    tpu.vector_store %arg5[%c0_9, %c0_10], %12 {strides = array<i32>} : memref<8x300xf32, #tpu.memory_space<vmem>>, vector<8x300xf32>,
    return
  }
  func.func @transform_0(%arg0: i32) -> (i32, i32) {
    %c0_i32 = arith.constant 0 : i32
    %c0_i32_0 = arith.constant 0 : i32
    return %arg0, %c0_i32 : i32, i32
  }
  func.func @transform_1(%arg0: i32) -> (i32, i32) {
    %c0_i32 = arith.constant 0 : i32
    %c0_i32_0 = arith.constant 0 : i32
    %c0_i32_1 = arith.constant 0 : i32
    return %c0_i32, %c0_i32_0 : i32, i32
  }
  func.func @transform_2(%arg0: i32) -> (i32, i32) {
    %c0_i32 = arith.constant 0 : i32
    %c0_i32_0 = arith.constant 0 : i32
    %c0_i32_1 = arith.constant 0 : i32
    return %c0_i32, %c0_i32_0 : i32, i32
  }
  func.func @transform_3(%arg0: i32) -> (i32, i32) {
    %c0_i32 = arith.constant 0 : i32
    %c0_i32_0 = arith.constant 0 : i32
    %c0_i32_1 = arith.constant 0 : i32
    return %c0_i32, %c0_i32_0 : i32, i32
  }
  func.func @transform_4(%arg0: i32) -> (i32, i32) {
    %c0_i32 = arith.constant 0 : i32
    %c0_i32_0 = arith.constant 0 : i32
    return %arg0, %c0_i32 : i32, i32
  }
}

</mosaic_0001>

<bundles_post_ra>
// kernel: tpu_custom_call.1
= control target key start
LH: loop header
LB: loop body
LE: loop exit
PB: predicated region body
PF: predicated region fallthrough
CT: control target
= control target key end

     0   :  { %9 = vsyncpa [#allocation3], 0  ;;  %s731_s0 = inlined_call_operand.vmem [shape: bf16[16,16], index: 0, kind: input, shape index: {}]   ;;  %s732_s1 = inlined_call_operand.vmem [shape: f32[16,4], index: 1, kind: input, shape index: {}]   ;;  %s733_s2 = inlined_call_operand.vmem [shape: f32[4,300], index: 2, kind: input, shape index: {}]   ;;  %s734_s3 = inlined_call_operand.vmem [shape: f32[1,300], index: 3, kind: input, shape index: {}]   ;;  %s735_s4 = inlined_call_operand.hbm [shape: f32[16,300], index: 4, kind: output, shape index: {}]  }
   0x1   :  { %11 = vsyncpa [#allocation3 + $0x1], 0  ;;  %s610_s15 = smov 0   ;;  %s612_s16 = smov 0  }
   0x2   :  { %s614_s17 = smov 0   ;;  %s616_s18 = smov 0  }
   0x3 LB: > { %s631_s19 = sadd.s32 4294967295, %s579_s18   ;;  %s444_s20 = sadd.s32 4294967294, %s579_s18   ;;  %s579_s18 = sphi %s616_s18, %s741_s18   ;;  %s575_s17 = sphi %s614_s17, %s740_s17   ;;  %s571_s16 = sphi %s612_s16, %s739_s16   ;;  %s567_s15 = sphi %s610_s15, %s738_s15  }
   0x4   : > { %s635_s21 = sadd.s32 1, %s579_s18   ;;  %s113_s22 = sadd.s32 1, %s575_s17 }
   0x5   : > { %s110_s23 = ssub.s32 %s579_s18, %s635_s21  ;;  %p123_p0 = scmp.ne.s32.totalorder %s575_s17, %s571_s16 }
   0x6   : > { %p111_p1 = scmp.eq.s32.totalorder %s110_s23, 0  ;;  %p124_p2 = scmp.eq.s32.totalorder %s631_s19, 1 }
   0x7   : > { %p129_p3 = scmp.ne.s32.totalorder %s571_s16, %s567_s15  ;;  %p130_p4 = scmp.eq.s32.totalorder %s444_s20, 1 }
   0x8   : > { %s646_s24 = scalar_select %p111_p1, %s575_s17, %s113_s22  }
   0x9   : > { %p648_p5 = por %p124_p2, %p123_p0  ;;  %p652_p6 = por %p130_p4, %p129_p3 }
   0xa   : > { %p447_p7 = scmp.ge.s32.totalorder %s579_s18, 1  ;;  %p164_p8 = scmp.lt.s32.totalorder %s579_s18, 3 }
   0xc   : > { %p165_p9 = pnand %p447_p7, %p164_p8 }
   0xd   : > { %v195_v0 = vld [vmem:[%s732_s1] sm:$0xff] (!%p165_p9)  ;;  %v196_v1 = vld [vmem:[%s732_s1 + $0x8] sm:$0xff] (!%p165_p9)  ;;  %p189_p10 = scmp.lt.s32.totalorder (!%p165_p9), %s631_s19, 1  ;;  %v581_v2 = vmov (!%p165_p9), 0.0   ;;  %vm582_vm0 = vmmov (!%p165_p9), 0   ;;  %vm272_vm1 = vcmask (!%p165_p9), 1041408   ;;  %v253_v19 = vlaneseq (!%p165_p9) }
   0xe   : > { %168 = sbr.rel (%p165_p9) target bundleno = 471 (0x1d7), region = 36  ;;  %460 = vmatprep.subr.bf16.mxu0 (!%p165_p9), %v581_v2  ;;  %v197_v3 = vpack.c.bf16 (!%p165_p9), %v196_v1, %v195_v0  ;;  %462 = vmatprep.mubr.msk.bf16.mxu0 (!%p165_p9), %vm582_vm0, %v581_v2  ;;  %v244_v4 = vld [vmem:[%s733_s2 + $0x8] sm:$0xf] (!%p165_p9)  ;;  %v243_v5 = vld [vmem:[%s733_s2] sm:$0xff] (!%p165_p9)  ;;  %vm198_vm2 = vcmask (!%p165_p9), 130048   ;;  %v583_v13 = vmov (!%p165_p9), 0  }
   0xf   : > { %v250_v6 = vpack.c.bf16 (!%p165_p9), %v244_v4, %v244_v4  ;;  %v246_v7 = vcombine.high (!%p165_p9), %v243_v5, %v243_v5  ;;  %v248_v11 = vpack.c.bf16 (!%p165_p9), %v243_v5, %v243_v5  ;;  %314 = vmatprep.mubr.bf16.mxu1 (!%p165_p9), %v583_v13  ;;  %vm268_vm3 = vcmask (!%p165_p9), 31744   ;;  %s186_s14 = sand.u32 (!%p165_p9), 1, %s571_s16   ;;  %v251_v23 = vld [vmem:[%s734_s3] sm:$0x7] (!%p165_p9)  ;;  %s473_s27 = smul.u32 (!%p165_p9), 384, %s631_s19 }
  0x10   : > { %461 = vmatpush3.bf16.msra.mxu0 (!%p165_p9), %v197_v3  ;;  %v254_v20 = vshrl.u32 (!%p165_p9), %v253_v19, 7  ;;  %s472_s20 = smul.u32 (!%p165_p9), 24, %s186_s14  ;;  %vm368_vm4 = vcmask (!%p165_p9), 359424   ;;  %s371_s6 = scalar_lea.sflag (!%p165_p9), [#allocation3], %s186_s14 }
  0x11   : > { %466 = vmatprep.subr.bf16.mxu0 (!%p165_p9), %v581_v2  ;;  %v249_v8 = vpack.c.bf16 (!%p165_p9), %v246_v7, %v246_v7  ;;  %v280_v9 = vsel (!%p165_p9), %vm272_vm1, %v250_v6, 0  ;;  %v274_v12 = vsel (!%p165_p9), %vm272_vm1, %v248_v11, 0  ;;  %s584_s8 = smov (!%p165_p9), [#allocation2]  }
  0x12   : > { %v255_v21 = vsub.s32 (!%p165_p9), 0, %v254_v20  ;;  %v263_v22 = vsub.s32 (!%p165_p9), 2, %v254_v20  ;;  %v259_v24 = vsub.s32 (!%p165_p9), 1, %v254_v20  ;;  %s188_s28 = scalar_lea.vmem (!%p165_p9), [#allocation2], %s472_s20 }
  0x13   : > { %450 = vmatprep.subr.msk.bf16.mxu1 (!%p165_p9), %vm272_vm1, %v249_v8  ;;  %s385_s29 = sshll.u32 (!%p165_p9), %s188_s28, 4  ;;  %s689_s29 = int_to_ptr.vmem [resolvable:$true] %s385_s29 }
  0x14   : > { %283 = vmatpush1.bf16.msra.mxu1 (!%p165_p9), %v274_v12  ;;  %v256_v25 = vrot.slane (!%p165_p9), %v251_v23, %v255_v21  ;;  %v264_v26 = vrot.slane (!%p165_p9), %v251_v23, %v263_v22  ;;  %v260_v27 = vrot.slane (!%p165_p9), %v251_v23, %v259_v24  ;;  %s517_s7 = scalar_lea.vmem (!%p165_p9), %s689_s29, 384 }
  0x15   : > { %s190_s9 = scalar_select %p189_p10, %s631_s19, 1 }
  0x16   : > { %s687_s19 = scalar_lea.hbm %s735_s4, %s473_s27  ;;  %p518_p11 = scmp.ne.s32.totalorder %s689_s29, %s517_s7 }
  0x17   : > { %s448_s10 = sshll.u32 %s190_s9, 2  ;;  %s521_s9 = sshll.u32 %s584_s8, 4  ;;  %s522_s9 = int_to_ptr.vmem [resolvable:$false] %s521_s9 }
  0x18   : > { %s192_s13 = scalar_lea.vmem %s731_s0, %s448_s10  ;;  %p519_p12 = pnand %p518_p11, %p648_p5 }
  0x19   : > { %v194_v10 = vld [vmem:[%s192_s13] sm:$0xf]  ;;  %s523_s10 = scalar_lea.vmem %s522_s9, 768  ;;  %p524_p0 = scmp.lt.s32.totalorder %s689_s29, %s522_s9 }
  0x1a   : > { %463 = vmatmul.mubr.msk.bf16.vlgmr.msra.gmra.mrb[0].mxu0 %vm198_vm2, %v194_v10  ;;  %p520_p13 = pneg %p519_p12  ;;  %p525_p1 = scmp.lt.s32.totalorder %s523_s10, %s517_s7 }
  0x1b   : > { %467 = vmatpush3.bf16.msra.mxu0 %v280_v9  ;;  %468 = vmatprep.mubr.msk.bf16.mxu0 %vm582_vm0, %v581_v2 }
  0x1c   : > { %p526_p2 = por %p525_p1, %p524_p0 }
  0x1e   : > { %p527_p3 = pnand %p526_p2, %p520_p13 }
  0xed   : > { %v236_v14 = vpop.f32.mrb[0].mxu0 }
  0xee   : > { %v242_v15 = vpack.c.bf16 %v236_v14, %v236_v14  ;;  %v464_v16 = vpop.f32.mrb[1].mxu0 }
  0xef   : > { %v239_v17 = vpop.f32.mrb[2].mxu0 }
  0xf0   : > { %v465_v18 = vpop.f32.mrb[3].mxu0  ;;  %451 = vmatmul.mubr.msk.bf16.vlgmr.msra.gmra.mrb[0].mxu1 %vm268_vm3, %v242_v15  ;;  %469 = vmatmul.mubr.msk.bf16.vlgmr.msra.gmra.mrb[4].mxu0 %vm268_vm3, %v242_v15 }
 0x1c3   : > { %v316_v28 = vpop.f32.mrb[0].mxu1  ;;  %v357_v29 = vpop.f32.mrb[4].mxu0 }
 0x1c4   : > { %v317_v30 = vadd.f32 %v316_v28, %v256_v25  ;;  %v358_v31 = vadd.f32 %v357_v29, %v264_v26  ;;  %v318_v32 = vpop.f32.mrb[1].mxu1  ;;  %v470_v33 = vpop.f32.mrb[5].mxu0 }
 0x1c5   : > { %v319_v34 = vadd.f32 %v318_v32, %v260_v27  ;;  %v320_v35 = vpop.f32.mrb[2].mxu1  ;;  %v360_v36 = vpop.f32.mrb[6].mxu0 }
 0x1c6   : > { %v363_v37 = vmax.f32 %v317_v30, 0.0  ;;  %v365_v38 = vmax.f32 %v358_v31, 0.0  ;;  %v321_v39 = vpop.f32.mrb[3].mxu1  ;;  %v471_v40 = vpop.f32.mrb[7].mxu0 }
 0x1c7   : > { %v364_v41 = vmax.f32 %v319_v34, 0.0 }
 0x1c8   : > { %366 = vst [vmem:[%s188_s28] sm:$0xff] %v363_v37  ;;  %369 = vst.msk [vmem:[%s188_s28 + $0x10] sm:$0xff] %vm368_vm4, %v365_v38 }
 0x1c9   : > { %367 = vst [vmem:[%s188_s28 + $0x8] sm:$0xff] %v364_v41 }
 0x1ca   : > { %530 = shalt.err (!%p527_p3)
}
 0x1cb   : > { %s531_s11 = scalar_lea.hbm %s687_s19, 384  ;;  %s535_s14 = scalar_lea.hbm %s735_s4, 768 }
 0x1cc   : > { %p532_p4 = scmp.ne.s32.totalorder %s687_s19, %s531_s11  ;;  %p536_p9 = scmp.lt.u32.totalorder %s687_s19, %s735_s4 }
 0x1cd   : > { %p537_p10 = scmp.lt.u32.totalorder %s535_s14, %s531_s11  ;;  %p539_p12 = scmp.lt.u32.totalorder %s531_s11, %s687_s19 }
 0x1ce   : > { %p533_p7 = pnand %p532_p4, %p648_p5 }
 0x1cf   : > { %p538_p11 = por %p537_p10, %p536_p9 }
 0x1d0   : > { %p534_p8 = pneg %p533_p7 }
 0x1d1   : > { %p540_p13 = por %p539_p12, %p538_p11 }
 0x1d3   : > { %p541_p0 = pnand %p540_p13, %p534_p8 }
 0x1d5   : > { %544 = shalt.err (!%p541_p0)
}
 0x1d6   : > { %474 = dma.vmem_to_hbm [thread:$0]  (%p648_p5), %s689_s29, 384, %s687_s19, %s371_s6  }
 0x1d7 PF: > { %p480_p1 = scmp.ge.s32.totalorder %s579_s18, 2  ;;  %s397_s23 = sand.u32 1, %s567_s15  }
 0x1d8   : > { %s398_s27 = scalar_lea.sflag [#allocation3], %s397_s23 }
 0x1d9   : > { %p477_p2 = pnand %p480_p1, %p652_p6 }
 0x1db   : > { %562 = dma.done.wait (!%p477_p2), %s398_s27, 384  }
 0x1dc   : > { %564 = vsyncadd (!%p477_p2), %s398_s27, 4294966912  ;;  %p14_p3 = scmp.ge.s32.totalorder %s635_s21, 4   ;;  %s738_s15 = smov %s571_s16 }
 0x1dd   : > { %s739_s16 = smov %s575_s17  ;;  %s740_s17 = smov %s646_s24 }
 0x1de   : > { %s741_s18 = smov %s635_s21  ;;  %16 = sbr.rel (!%p14_p3) target bundleno = 3 (0x3), region = 71 }
 0x1e5   :  { %403 = vsyncpa [#allocation3], 1 }
 0x1e6   :  { %405 = vsyncpa [#allocation3 + $0x1], 1 }

</bundles_post_ra>
